<compile_context>
chip_gen: v5e
topology: v5e:2x2
jax: 0.10.0
libtpu: 0.0.40
codegen_flags: <defaults>
</compile_context>

<pallas_src>
import functools
import math

import jax
import jax.numpy as jnp
import numpy as np
from jax.experimental import pallas as pl
from jax.experimental.pallas import tpu as pltpu


def _wise_linear_kernel(x_ref, w_ref, b_ref, o_ref, acc_ref, *, compute_dtype):
    # x_ref: (tm, tk)   w_ref: (tn, tk)  [native (out, in) layout]
    # b_ref: (1, tn)    o_ref: (tm, tn)  acc_ref: VMEM (tm, tn) f32, resident across K axis.
    k = pl.program_id(2)

    x = x_ref[...].astype(compute_dtype)
    w = w_ref[...].astype(compute_dtype)
    prec = (jax.lax.Precision.HIGHEST
            if jnp.dtype(compute_dtype) == jnp.dtype(jnp.float32) else None)
    # Contract the K (last) axis of both operands: x @ w.T on the MXU, f32 accumulation.
    p_block = jax.lax.dot_general(
        x, w,
        dimension_numbers=(((1,), (1,)), ((), ())),
        precision=prec,
        preferred_element_type=jnp.float32,
    )

    @pl.when(k == 0)
    def _():
        acc_ref[...] = p_block          # init with first partial product (no zero-fill)

    @pl.when(k > 0)
    def _():
        acc_ref[...] += p_block

    @pl.when(k == pl.num_programs(2) - 1)
    def _():
        out = acc_ref[...] + b_ref[...].astype(jnp.float32)
        o_ref[...] = out.astype(o_ref.dtype)


def _choose_tile(dim, cap, align):
    """Largest multiple of `align` that divides `dim` and is <= cap; else full dim."""
    cap = min(cap, dim)
    t = (cap // align) * align
    while t >= align:
        if dim % t == 0:
            return t
        t -= align
    return dim  # full-extent block (always layout-legal)


def wise_linear(x, weight, bias, *, tm=None, tn=None, tk=None,
                compute_dtype=jnp.bfloat16):
    """Equivalent to torch.nn.functional.linear(x, weight, bias).

    x: (B, K), weight: (N, K) [native PyTorch layout], bias: (N,) -> (B, N).
    compute_dtype: MXU operand dtype (bf16 default; accumulation is always f32).
    Storing params in bf16 additionally halves weight-streaming HBM traffic.
    """
    B, K = x.shape
    N, K2 = weight.shape
    assert K == K2, f"in_features mismatch: {K} vs {K2}"

    # ---- tile selection -----------------------------------------------------
    tm_cap = 512 if tm is None else tm
    tn_cap = 512 if tn is None else tn
    tk_cap = 1024 if tk is None else tk

    tm_ = _choose_tile(B, tm_cap, 8)
    # Small-batch / GEMV-like shapes: single M block => weight streams from HBM
    # exactly once (traffic floor); spend the VMEM budget on larger tn/tk.
    if tm is None and tm_ == B and B <= 512:
        if tn is None:
            tn_cap = 1024
        if tk is None:
            tk_cap = 2048
    tn_ = _choose_tile(N, tn_cap, 128)
    tk_ = _choose_tile(K, tk_cap, 128)

    # Keep at least 2 blocks on a "parallel" axis so both v7x TensorCores get work.
    if (B // tm_) == 1 and (N // tn_) == 1 and N % 256 == 0:
        tn_ = N // 2

    grid = (B // tm_, N // tn_, K // tk_)

    # ---- VMEM budget & cost estimate -----------------------------------------
    x_item = jnp.dtype(x.dtype).itemsize
    w_item = jnp.dtype(weight.dtype).itemsize
    b_item = jnp.dtype(bias.dtype).itemsize
    out_dtype = x.dtype
    o_item = jnp.dtype(out_dtype).itemsize

    # double-buffered in/out tiles + resident f32 accumulator
    vmem_est = (2 * (tm_ * tk_ * x_item + tn_ * tk_ * w_item + tn_ * b_item)
                + 2 * tm_ * tn_ * o_item
                + tm_ * tn_ * 4)
    vmem_limit = int(min(max(16 << 20, 1.5 * vmem_est + (2 << 20)), 48 << 20))

    cost = pl.CostEstimate(
        flops=2 * B * N * K,
        transcendentals=0,
        bytes_accessed=int(x_item * B * K * (N // tn_)      # x re-read per N block
                           + w_item * K * N * (B // tm_)    # W re-read per M block
                           + o_item * B * N                  # output written once
                           + b_item * N * (B // tm_)),       # bias re-read per M block
    )

    kernel = functools.partial(_wise_linear_kernel, compute_dtype=compute_dtype)

    return pl.pallas_call(
        kernel,
        out_shape=jax.ShapeDtypeStruct((B, N), out_dtype),
        grid_spec=pltpu.PrefetchScalarGridSpec(
            num_scalar_prefetch=0,
            grid=grid,
            in_specs=[
                pl.BlockSpec((tm_, tk_), lambda i, j, k: (i, k)),   # x tile
                pl.BlockSpec((tn_, tk_), lambda i, j, k: (j, k)),   # W tile, native (N, K)
                pl.BlockSpec((1, tn_), lambda i, j, k: (0, j)),     # bias tile
            ],
            out_specs=pl.BlockSpec((tm_, tn_), lambda i, j, k: (i, j)),
            scratch_shapes=[pltpu.VMEM((tm_, tn_), jnp.float32)],
        ),
        compiler_params=pltpu.CompilerParams(
            dimension_semantics=("parallel", "parallel", "arbitrary"),
            vmem_limit_bytes=vmem_limit,
        ),
        cost_estimate=cost,
    )(x, weight, bias.reshape(1, N))


def init_wise_linear_params(key, in_features, out_features, dtype=jnp.float32):
    """Matches WiseLinear.reset_parameters(): kaiming_uniform_(a=sqrt(5)) for weight,
       uniform(-1/sqrt(fan_in), 1/sqrt(fan_in)) for bias."""
    kw, kb = jax.random.split(key)
    fan_in = in_features
    w_bound = math.sqrt(2.0 / (1.0 + 5.0)) * math.sqrt(3.0 / fan_in)
    b_bound = 1.0 / math.sqrt(fan_in) if fan_in > 0 else 0.0
    weight = jax.random.uniform(
        kw, (out_features, in_features), dtype, minval=-w_bound, maxval=w_bound)
    bias = jax.random.uniform(
        kb, (out_features,), dtype, minval=-b_bound, maxval=b_bound)
    return weight, bias


if __name__ == "__main__":
    key = jax.random.PRNGKey(0)
    k_x, k_p = jax.random.split(key)

    # Small shapes that still exercise the tiled K-reduction, N-parallel axis,
    # bias epilogue and the small-batch (tm = B) path.
    batch = 16
    in_features = 256
    out_features = 256

    x = jax.random.normal(k_x, (batch, in_features), jnp.float32)
    weight, bias = init_wise_linear_params(k_p, in_features, out_features)

    # Host f64 reference (== F.linear semantics).
    y_ref = (np.asarray(x, np.float64) @ np.asarray(weight, np.float64).T
             + np.asarray(bias, np.float64)[None, :])

    # Production default: bf16 MXU operands, f32 accumulation (looser tolerance).
    fn_bf16 = jax.jit(functools.partial(wise_linear, tk=128))  # tk=128 -> K accumulation path
    y = jax.block_until_ready(fn_bf16(x, weight, bias))
    assert y.shape == (batch, out_features)
    np.testing.assert_allclose(np.asarray(y, np.float64), y_ref, atol=3e-2, rtol=3e-2)

    # f32 operand path: tight check of tiling / accumulation / bias epilogue.
    fn_f32 = jax.jit(functools.partial(wise_linear, tk=128, compute_dtype=jnp.float32))
    y32 = jax.block_until_ready(fn_f32(x, weight, bias))
    np.testing.assert_allclose(np.asarray(y32, np.float64), y_ref, atol=1e-4, rtol=1e-4)

    print("KERNEL_OK")
</pallas_src>

<mosaic_0001>
module attributes {stable_mosaic.version = 11 : i64} {
  func.func @_wise_linear_kernel(%arg0: i32, %arg1: i32, %arg2: i32, %arg3: memref<16x128xf32, #tpu.memory_space<vmem>>, %arg4: memref<128x128xf32, #tpu.memory_space<vmem>>, %arg5: memref<1x128xf32, #tpu.memory_space<vmem>>, %arg6: memref<16x128xf32, #tpu.memory_space<vmem>>, %arg7: memref<16x128xf32, #tpu.memory_space<vmem>>) attributes {dimension_semantics = [#tpu.dimension_semantics<parallel>, #tpu.dimension_semantics<parallel>, #tpu.dimension_semantics<arbitrary>], iteration_bounds = array<i64: 1, 2, 2>, scalar_prefetch = 0 : i64, scratch_operands = 1 : i64, tpu.core_type = #tpu.core_type<tc>, window_params = [{transform_indices = @transform_0, window_bounds = array<i64: 16, 128>}, {transform_indices = @transform_1, window_bounds = array<i64: 128, 128>}, {transform_indices = @transform_2, window_bounds = array<i64: 1, 128>}, {transform_indices = @transform_3, window_bounds = array<i64: 16, 128>}]} {
    %c0 = arith.constant 0 : index
    %c0_0 = arith.constant 0 : index
    %0 = vector.load %arg3[%c0, %c0_0] : memref<16x128xf32, #tpu.memory_space<vmem>>, vector<16x128xf32>
    %1 = arith.truncf %0 : vector<16x128xf32> to vector<16x128xbf16>
    %c0_1 = arith.constant 0 : index
    %c0_2 = arith.constant 0 : index
    %2 = vector.load %arg4[%c0_1, %c0_2] : memref<128x128xf32, #tpu.memory_space<vmem>>, vector<128x128xf32>
    %3 = arith.truncf %2 : vector<128x128xf32> to vector<128x128xbf16>
    %cst = arith.constant dense<0.000000e+00> : vector<16x128xf32>
    %4 = tpu.matmul %1, %3, %cst {dimension_numbers = #tpu.dot_dimension_numbers<[1], [1], [0], [0], [0, 0, 1, 0], [], []>} : vector<16x128xbf16>, vector<128x128xbf16>, vector<16x128xf32> -> vector<16x128xf32>
    %c0_i32 = arith.constant 0 : i32
    %5 = arith.cmpi eq, %arg2, %c0_i32 : i32
    %6 = arith.extui %5 : i1 to i32
    %c0_i32_3 = arith.constant 0 : i32
    %7 = arith.cmpi ne, %6, %c0_i32_3 : i32
    scf.if %7 {
      %c0_7 = arith.constant 0 : index
      %c0_8 = arith.constant 0 : index
      %14 = vector.load %arg7[%c0_7, %c0_8] : memref<16x128xf32, #tpu.memory_space<vmem>>, vector<16x128xf32>
      tpu.vector_store %arg7[%c0_7, %c0_8], %4 {strides = array<i32>} : memref<16x128xf32, #tpu.memory_space<vmem>>, vector<16x128xf32>,
    } else {
    }
    %c0_i32_4 = arith.constant 0 : i32
    %8 = arith.cmpi sgt, %arg2, %c0_i32_4 : i32
    %9 = arith.extui %8 : i1 to i32
    %c0_i32_5 = arith.constant 0 : i32
    %10 = arith.cmpi ne, %9, %c0_i32_5 : i32
    scf.if %10 {
      %c0_7 = arith.constant 0 : index
      %c0_8 = arith.constant 0 : index
      %14 = vector.load %arg7[%c0_7, %c0_8] : memref<16x128xf32, #tpu.memory_space<vmem>>, vector<16x128xf32>
      %15 = arith.addf %14, %4 : vector<16x128xf32>
      %c0_9 = arith.constant 0 : index
      %c0_10 = arith.constant 0 : index
      %16 = vector.load %arg7[%c0_9, %c0_10] : memref<16x128xf32, #tpu.memory_space<vmem>>, vector<16x128xf32>
      tpu.vector_store %arg7[%c0_9, %c0_10], %15 {strides = array<i32>} : memref<16x128xf32, #tpu.memory_space<vmem>>, vector<16x128xf32>,
    } else {
    }
    %c1_i32 = arith.constant 1 : i32
    %11 = arith.cmpi eq, %arg2, %c1_i32 : i32
    %12 = arith.extui %11 : i1 to i32
    %c0_i32_6 = arith.constant 0 : i32
    %13 = arith.cmpi ne, %12, %c0_i32_6 : i32
    scf.if %13 {
      %c0_7 = arith.constant 0 : index
      %c0_8 = arith.constant 0 : index
      %14 = vector.load %arg7[%c0_7, %c0_8] : memref<16x128xf32, #tpu.memory_space<vmem>>, vector<16x128xf32>
      %c0_9 = arith.constant 0 : index
      %c0_10 = arith.constant 0 : index
      %15 = vector.load %arg5[%c0_9, %c0_10] : memref<1x128xf32, #tpu.memory_space<vmem>>, vector<1x128xf32>
      %16 = vector.broadcast %15 : vector<1x128xf32> to vector<16x128xf32>
      %17 = arith.addf %14, %16 : vector<16x128xf32>
      %c0_11 = arith.constant 0 : index
      %c0_12 = arith.constant 0 : index
      %18 = vector.load %arg6[%c0_11, %c0_12] : memref<16x128xf32, #tpu.memory_space<vmem>>, vector<16x128xf32>
      tpu.vector_store %arg6[%c0_11, %c0_12], %17 {strides = array<i32>} : memref<16x128xf32, #tpu.memory_space<vmem>>, vector<16x128xf32>,
    } else {
    }
    return
  }
  func.func @transform_0(%arg0: i32, %arg1: i32, %arg2: i32) -> (i32, i32) {
    %c0_i32 = arith.constant 0 : i32
    return %arg0, %arg2 : i32, i32
  }
  func.func @transform_1(%arg0: i32, %arg1: i32, %arg2: i32) -> (i32, i32) {
    %c0_i32 = arith.constant 0 : i32
    return %arg1, %arg2 : i32, i32
  }
  func.func @transform_2(%arg0: i32, %arg1: i32, %arg2: i32) -> (i32, i32) {
    %c0_i32 = arith.constant 0 : i32
    %c0_i32_0 = arith.constant 0 : i32
    return %c0_i32, %arg1 : i32, i32
  }
  func.func @transform_3(%arg0: i32, %arg1: i32, %arg2: i32) -> (i32, i32) {
    %c0_i32 = arith.constant 0 : i32
    return %arg0, %arg1 : i32, i32
  }
}

</mosaic_0001>

<bundles_post_ra>
// kernel: wise_linear.1
= control target key start
LH: loop header
LB: loop body
LE: loop exit
PB: predicated region body
PF: predicated region fallthrough
CT: control target
= control target key end

     0   :  { %s1209_s0 = inlined_call_operand.hbm [shape: f32[16,256], index: 0, kind: input, shape index: {}]   ;;  %s1210_s1 = inlined_call_operand.hbm [shape: f32[256,256], index: 1, kind: input, shape index: {}]   ;;  %s1211_s2 = inlined_call_operand.vmem [shape: f32[1,256], index: 2, kind: input, shape index: {}]   ;;  %s1212_s3 = inlined_call_operand.hbm [shape: f32[16,256], index: 3, kind: output, shape index: {}]  }
   0x1   :  { %1222 = sst [smem:[#allocation20_spill]] %s1209_s0 }
   0x2   :  { %1223 = sst [smem:[#allocation21_spill]] %s1211_s2 }
   0x3   :  { %1224 = sst [smem:[#allocation22_spill]] %s1212_s3 }
   0x4   :  { %8 = vsyncpa [#allocation4], 0 }
   0x5   :  { %10 = vsyncpa [#allocation4 + $0x1], 0 }
   0x6   :  { %11 = vsyncpa [#allocation7], 0 }
   0x7   :  { %13 = vsyncpa [#allocation7 + $0x1], 0 }
   0x8   :  { %14 = vsyncpa [#allocation5], 0 }
   0x9   :  { %16 = vsyncpa [#allocation5 + $0x1], 0  ;;  %s891_s12 = smov 0   ;;  %s893_s13 = smov 0  }
   0xa   :  { %s895_s14 = smov 0   ;;  %s897_s15 = smov 0  }
   0xb   :  { %s899_s16 = smov 0   ;;  %s901_s17 = smov 0  }
   0xc   :  { %s903_s18 = smov 0   ;;  %s905_s19 = smov 0  }
   0xd   :  { %s907_s20 = smov 0   ;;  %s909_s21 = smov 0  }
   0xe   :  { %s911_s22 = smov 0   ;;  %s913_s23 = smov 0  }
   0xf   :  { %s915_s24 = smov 0   ;;  %s917_s25 = smov 0  }
  0x10 LB: > { %1225 = sst [smem:[#allocation12_spill]] %s831_s17  ;;  %s493_s26 = sadd.s32 4294967295, %s863_s25   ;;  %s863_s25 = sphi %s917_s25, %s22_s25   ;;  %s859_s24 = sphi %s915_s24, %s1274_s24   ;;  %s855_s23 = sphi %s913_s23, %s1273_s23   ;;  %s851_s22 = sphi %s911_s22, %s1272_s22   ;;  %s847_s21 = sphi %s909_s21, %s1271_s21   ;;  %s843_s20 = sphi %s907_s20, %s1270_s20   ;;  %s839_s19 = sphi %s905_s19, %s1269_s19   ;;  %s835_s18 = sphi %s903_s18, %s1268_s18   ;;  %s831_s17 = sphi %s901_s17, %s1257_s17   ;;  %s827_s16 = sphi %s899_s16, %s1267_s16   ;;  %s823_s15 = sphi %s897_s15, %s1266_s15   ;;  %s819_s14 = sphi %s895_s14, %s1265_s14   ;;  %s815_s13 = sphi %s893_s13, %s1264_s13   ;;  %s811_s12 = sphi %s891_s12, %s1263_s12  }
  0x11   : > { %1226 = sst [smem:[#allocation13_spill]] %s843_s20  ;;  %s34_s27 = sadd.s32 1, %s855_s23 }
  0x12   : > { %1227 = sst [smem:[#allocation14_spill]] %s847_s21  ;;  %p961_p0 = scmp.ge.s32.totalorder %s34_s27, 2 }
  0x13   : > { %s50_s29 = sadd.s32 1, %s843_s20  ;;  %p57_p1 = scmp.ne.s32.totalorder %s843_s20, %s839_s19 }
  0x14   : > { %p58_p2 = scmp.eq.s32.totalorder %s863_s25, 0  ;;  %s1276_s27 = smov (%p961_p0, %s34_s27), 0 }
  0x15   : > { %1229 = sst [smem:[#allocation15_spill]] %s1276_s27  ;;  %p63_p4 = scmp.ne.s32.totalorder %s839_s19, %s835_s18 }
  0x16   : > { %p975_p3 = por %p58_p2, %p57_p1  ;;  %s982_s4 = ssub.s32 %s855_s23, %s1276_s27 }
  0x17   : > { %p984_p5 = scmp.eq.s32.totalorder %s493_s26, 0  ;;  %p48_p6 = scmp.eq.s32.totalorder %s982_s4, 0 }
  0x18   : > { %p989_p7 = scmp.eq.s32.totalorder %s493_s26, 3  ;;  %p1215_p9 = scmp.lt.s32.totalorder %s863_s25, 4 }
  0x19   : > { %p995_p8 = por %p984_p5, %p63_p4  ;;  %s169_s9 = sand.u32 1, %s843_s20  }
  0x1a   : > { %s1000_s8 = scalar_select %p48_p6, %s843_s20, %s50_s29  }
  0x1b   : > { %s497_s10 = sshll.u32 %s169_s9, 4  ;;  %s498_s11 = sshll.u32 %s855_s23, 3 }
  0x1c   : > { %1234 = sst [smem:[#allocation16_spill]] %s1000_s8  ;;  %s173_s3 = scalar_lea.vmem [#allocation3], %s497_s10 }
  0x1d   : > { %s1235_s0 = sld [smem:[#allocation20_spill]]  ;;  %s183_s21 = sshll.u32 %s173_s3, 4  ;;  %s184_s21 = int_to_ptr.vmem [resolvable:$true] %s183_s21 }
  0x1e   : > { %p522_p10 = pnand %p1215_p9, %p975_p3  ;;  %s170_s27 = scalar_lea.sflag [#allocation4], %s169_s9 }
  0x1f   : > { %s1216_s29 = smov 256   ;;  %s1217_s10 = smov 128  }
  0x20   : > { %p503_p11 = scmp.ge.s32.totalorder %s863_s25, 1  ;;  %p221_p12 = scmp.lt.s32.totalorder %s863_s25, 5 }
  0x21   : > { %s494_s30 = sadd.s32 4294967294, %s863_s25   ;;  %s37_s9 = sadd.s32 1, %s859_s24 }
  0x22   : > { %p1017_p13 = pnand %p503_p11, %p221_p12  ;;  %s78_s18 = sadd.s32 1, %s831_s17 }
  0x23   : > { %s180_s26 = scalar_lea.hbm %s1235_s0, %s498_s11  ;;  %s1218_s11 = smov 8  }
  0x24   : > { %s181_s2 = sshll.u32 %s180_s26, 4  ;;  %s1278_s9 = smov (!%p961_p0, %s37_s9), %s859_s24  ;;  %s182_s2 = int_to_ptr.hbm [resolvable:$true] %s181_s2 }
  0x25   : > { %524 = dma.hbm_to_vmem [thread:$0]  (!%p522_p10), %s182_s2, 256, %s184_s21, %s170_s27, %s1216_s29, %s1217_s10, %s1218_s11  }
  0x26   : > { %p85_p1 = scmp.ne.s32.totalorder %s831_s17, %s827_s16  ;;  %p91_p3 = scmp.ne.s32.totalorder %s827_s16, %s823_s15 }
  0x27   : > { %p39_p4 = scmp.ge.s32.totalorder %s1278_s9, 2  ;;  %s132_s2 = sadd.s32 1, %s819_s14 }
  0x28   : > { %p1034_p6 = por %p85_p1, %p58_p2  ;;  %p1040_p10 = por %p91_p3, %p984_p5 }
  0x29   : > { %s1280_s9 = smov (%p39_p4, %s1278_s9), 0  ;;  %p142_p0 = scmp.ne.s32.totalorder %s819_s14, %s815_s13 }
  0x2a   : > { %1239 = sst [smem:[#allocation17_spill]] %s1280_s9  ;;  %p148_p11 = scmp.ne.s32.totalorder %s815_s13, %s811_s12 }
  0x2b   : > { %s73_s15 = ssub.s32 %s859_s24, %s1280_s9  ;;  %p149_p12 = scmp.eq.s32.totalorder %s494_s30, 3 }
  0x2c   : > { %s75_s28 = sor.u32 %s73_s15, %s982_s4  ;;  %p130_p2 = scmp.eq.s32.totalorder %s73_s15, 0 }
  0x2d   : > { %p76_p1 = scmp.eq.s32.totalorder %s75_s28, 0  ;;  %p1055_p9 = por %p989_p7, %p142_p0 }
  0x2e   : > { %s1060_s27 = scalar_select %p130_p2, %s819_s14, %s132_s2  }
  0x2f   : > { %s1063_s29 = scalar_select %p76_p1, %s831_s17, %s78_s18  }
  0x30   : > { %1241 = sst [smem:[#allocation18_spill]] %s1060_s27  ;;  %p1065_p5 = por %p149_p12, %p148_p11 }
  0x31   : > { %1242 = sst [smem:[#allocation19_spill]] %s1063_s29  ;;  %s193_s11 = sand.u32 1, %s831_s17  }
  0x32   : > { %s499_s30 = sshll.u32 %s193_s11, 7  ;;  %s514_s4 = sshll.u32 %s859_s24, 5 }
  0x33   : > { %s202_s0 = sadd.s32 %s855_s23, %s514_s4  ;;  %s197_s9 = scalar_lea.vmem [#allocation6], %s499_s30 }
  0x34   : > { %s207_s15 = sshll.u32 %s197_s9, 4  ;;  %s502_s28 = sshll.u32 %s202_s0, 3  ;;  %s208_s15 = int_to_ptr.vmem [resolvable:$true] %s207_s15 }
  0x35   : > { %s204_s20 = scalar_lea.hbm %s1210_s1, %s502_s28  ;;  %p1244_p7 = scmp.lt.s32.totalorder %s863_s25, 4 }
  0x36   : > { %s205_s18 = sshll.u32 %s204_s20, 4  ;;  %s194_s2 = scalar_lea.sflag [#allocation7], %s193_s11  ;;  %s206_s18 = int_to_ptr.hbm [resolvable:$true] %s205_s18 }
  0x37   : > { %p525_p3 = pnand %p1244_p7, %p1034_p6  ;;  %s1245_s29 = smov 8  }
  0x38   : > { %s1246_s27 = smov 128   ;;  %s1247_s17 = smov 256  }
  0x39   : > { %527 = dma.hbm_to_vmem [thread:$0]  (!%p525_p3), %s206_s18, 2048, %s208_s15, %s194_s2, %s1247_s17, %s1246_s27, %s1245_s29  }
  0x3a   : > { %225 = sbr.rel (%p1017_p13) target bundleno = 329 (0x149), region = 32  ;;  %s227_s0 = sand.u32 (!%p1017_p13), 1, %s839_s19  }
  0x3b   : > { %s1085_s9 = sshll.u32 (!%p1017_p13), %s227_s0, 4  ;;  %s228_s8 = scalar_lea.sflag (!%p1017_p13), [#allocation4], %s227_s0 }
  0x3c   : > { %s231_s21 = scalar_lea.vmem (!%p1017_p13), [#allocation3], %s1085_s9 }
  0x3f   : > { %798 = dma.done.wait (%p995_p8), %s228_s8, 256  }
  0x40   : > { %800 = vsyncadd (%p995_p8), %s228_s8, 4294967040  ;;  %s237_s20 = sand.u32 1, %s827_s16  }
  0x41   : > { %s505_s17 = sshll.u32 %s237_s20, 7  ;;  %s238_s29 = scalar_lea.sflag [#allocation7], %s237_s20 }
  0x42   : > { %s1093_s11 = scalar_lea.vmem [#allocation6], %s505_s17 }
  0x43   : > { %802 = dma.done.wait (%p1040_p10), %s238_s29, 2048  }
  0x44   : > { %804 = vsyncadd (%p1040_p10), %s238_s29, 4294965248  ;;  %s270_s7 = sand.u32 1, %s815_s13   ;;  %p275_p8 = scmp.lt.s32.totalorder %s851_s22, 1  ;;  %v296_v0 = vld [vmem:[%s1093_s11 + $0x70] sm:$0xff]  ;;  %v297_v1 = vld [vmem:[%s1093_s11 + $0x78] sm:$0xff] }
  0x45   : > { %s1103_s3 = sshll.u32 %s270_s7, 4  ;;  %s1248_s4 = sld [smem:[#allocation21_spill]]  ;;  %v305_v2 = vpack.c.bf16 %v297_v1, %v296_v0  ;;  %v294_v3 = vld [vmem:[%s1093_s11 + $0x60] sm:$0xff]  ;;  %v295_v4 = vld [vmem:[%s1093_s11 + $0x68] sm:$0xff]  ;;  %v292_v6 = vld [vmem:[%s1093_s11 + $0x50] sm:$0xff] }
  0x46   : > { %s1106_s27 = scalar_select %p275_p8, %s851_s22, 1  ;;  %v304_v5 = vpack.c.bf16 %v295_v4, %v294_v3  ;;  %v293_v7 = vld [vmem:[%s1093_s11 + $0x58] sm:$0xff]  ;;  %v290_v9 = vld [vmem:[%s1093_s11 + $0x40] sm:$0xff]  ;;  %v291_v10 = vld [vmem:[%s1093_s11 + $0x48] sm:$0xff] }
  0x47   : > { %306 = vmatpush.bf16.xpose.msra.mxu0 %v305_v2  ;;  %v303_v8 = vpack.c.bf16 %v293_v7, %v292_v6  ;;  %v302_v11 = vpack.c.bf16 %v291_v10, %v290_v9  ;;  %v288_v12 = vld [vmem:[%s1093_s11 + $0x30] sm:$0xff]  ;;  %v289_v13 = vld [vmem:[%s1093_s11 + $0x38] sm:$0xff]  ;;  %v286_v15 = vld [vmem:[%s1093_s11 + $0x20] sm:$0xff]  ;;  %s272_s28 = scalar_lea.vmem [#allocation8], %s1103_s3  ;;  %s1249_s6 = sld [smem:[#allocation14_spill]] }
  0x48   : > { %v301_v14 = vpack.c.bf16 %v289_v13, %v288_v12  ;;  %v287_v16 = vld [vmem:[%s1093_s11 + $0x28] sm:$0xff]  ;;  %v284_v18 = vld [vmem:[%s1093_s11 + $0x10] sm:$0xff]  ;;  %v285_v19 = vld [vmem:[%s1093_s11 + $0x18] sm:$0xff] }
  0x49   : > { %v300_v17 = vpack.c.bf16 %v287_v16, %v286_v15  ;;  %v299_v20 = vpack.c.bf16 %v285_v19, %v284_v18  ;;  %v282_v21 = vld [vmem:[%s1093_s11] sm:$0xff]  ;;  %v283_v22 = vld [vmem:[%s1093_s11 + $0x8] sm:$0xff] }
  0x4a   : > { %v298_v23 = vpack.c.bf16 %v283_v22, %v282_v21  ;;  %v279_v24 = vld [vmem:[%s231_s21] sm:$0xff]  ;;  %v280_v25 = vld [vmem:[%s231_s21 + $0x8] sm:$0xff] }
  0x4b   : > { %s277_s15 = scalar_lea.vmem %s1248_s4, %s1106_s27  ;;  %v281_v26 = vpack.c.bf16 %v280_v25, %v279_v24 }
  0x4d   : > { %p507_p13 = scmp.ne.s32.totalorder %s1249_s6, 0 }
  0x4f   : > { %307 = vmatpush.bf16.xpose.msra.mxu0 %v304_v5 }
  0x57   : > { %308 = vmatpush.bf16.xpose.msra.mxu0 %v303_v8 }
  0x5f   : > { %309 = vmatpush.bf16.xpose.msra.mxu0 %v302_v11 }
  0x67   : > { %310 = vmatpush.bf16.xpose.msra.mxu0 %v301_v14 }
  0x6f   : > { %311 = vmatpush.bf16.xpose.msra.mxu0 %v300_v17 }
  0x77   : > { %312 = vmatpush.bf16.xpose.msra.mxu0 %v299_v20 }
  0x7f   : > { %313 = vmatpush.bf16.xpose.msra.mxu0 %v298_v23 }
  0x86   : > { %314 = vmatmul.bf16.vlgmr.msra.gmra.mxu0 %v281_v26 }
 0x103   : > { %v315_v27 = vpop.f32.mrf.mxu0 }
 0x107   : > { %323 = sbr.rel (%p507_p13) target bundleno = 270 (0x10e), region = 44 }
 0x10b   : > { %v317_v28 = vpop.f32.mrf.mxu0 }
 0x10c   : > { %324 = vst [vmem:[#allocation2] sm:$0xff] %v315_v27 }
 0x10d   : > { %325 = vst [vmem:[#allocation2 + $0x8] sm:$0xff] %v317_v28 }
 0x10e PF: > { %s1250_s18 = sld [smem:[#allocation14_spill]] }
 0x114   : > { %p508_p4 = scmp.le.s32.totalorder %s1250_s18, 0 }
 0x116   : > { %329 = sbr.rel (%p508_p4) target bundleno = 288 (0x120), region = 48 }
 0x11b   : > { %v330_v29 = vld [vmem:[#allocation2] sm:$0xff]  ;;  %v331_v30 = vld [vmem:[#allocation2 + $0x8] sm:$0xff] }
 0x11c   : > { %v332_v31 = vadd.f32 %v330_v29, %v315_v27  ;;  %v333_v32 = vadd.f32 %v331_v30, %v317_v28 }
 0x11e   : > { %334 = vst [vmem:[#allocation2] sm:$0xff] %v332_v31 }
 0x11f   : > { %335 = vst [vmem:[#allocation2 + $0x8] sm:$0xff] %v333_v32 }
 0x120 PF: > { %s1251_s2 = sld [smem:[#allocation14_spill]] }
 0x126   : > { %p509_p6 = scmp.ne.s32.totalorder %s1251_s2, 1 }
 0x128   : > { %339 = sbr.rel (%p509_p6) target bundleno = 307 (0x133), region = 52 }
 0x12d   : > { %v340_v33 = vld [vmem:[#allocation2] sm:$0xff]  ;;  %v341_v35 = vld [vmem:[#allocation2 + $0x8] sm:$0xff] }
 0x12e   : > { %v652_v34 = vld [vmem:[%s277_s15] ss:$0 sm:$0xff] }
 0x12f   : > { %v346_v36 = vadd.f32 %v652_v34, %v340_v33  ;;  %v347_v37 = vadd.f32 %v652_v34, %v341_v35 }
 0x131   : > { %348 = vst [vmem:[%s272_s28] sm:$0xff] %v346_v36 }
 0x132   : > { %349 = vst [vmem:[%s272_s28 + $0x8] sm:$0xff] %v347_v37 }
 0x133 PF: > { %s511_s21 = sshll.u32 %s851_s22, 3  ;;  %s1253_s29 = sld [smem:[#allocation22_spill]] }
 0x134   : > { %s365_s3 = sshll.u32 %s272_s28, 4  ;;  %s351_s27 = scalar_lea.sflag [#allocation5], %s270_s7  ;;  %s366_s3 = int_to_ptr.vmem [resolvable:$true] %s365_s3 }
 0x139   : > { %s364_s11 = scalar_lea.hbm %s1253_s29, %s511_s21  ;;  %s733_s22 = scalar_lea.hbm %s1253_s29, 32 }
 0x13a   : > { %s367_s26 = sshll.u32 %s364_s11, 4  ;;  %s368_s26 = int_to_ptr.hbm [resolvable:$true] %s367_s26 }
 0x13b   : > { %s727_s30 = sshra.s32 %s368_s26, 4  ;;  %s728_s30 = int_to_ptr.hbm [resolvable:$true] %s727_s30 }
 0x13c   : > { %s729_s4 = scalar_lea.hbm %s728_s30, 16  ;;  %p734_p12 = scmp.lt.s32.totalorder %s728_s30, %s1253_s29 }
 0x13d   : > { %p730_p10 = scmp.ne.s32.totalorder %s728_s30, %s729_s4  ;;  %p735_p2 = scmp.lt.s32.totalorder %s733_s22, %s729_s4 }
 0x13f   : > { %p731_p0 = pnand %p730_p10, %p1055_p9  ;;  %p736_p1 = por %p735_p2, %p734_p12 }
 0x141   : > { %p732_p11 = pneg %p731_p0 }
 0x143   : > { %p737_p7 = pnand %p736_p1, %p732_p11 }
 0x145   : > { %740 = shalt.err (!%p737_p7)
}
 0x146   : > { %s868_s7 = smov 128   ;;  %s869_s28 = smov 256  }
 0x147   : > { %s870_s0 = smov 8  }
 0x148   : > { %519 = dma.vmem_to_hbm [thread:$0]  (%p1055_p9), %s366_s3, 256, %s368_s26, %s351_s27, %s868_s7, %s869_s28, %s870_s0  }
 0x149 PF: > { %p533_p3 = scmp.ge.s32.totalorder %s863_s25, 2  ;;  %s382_s9 = sand.u32 1, %s811_s12  }
 0x14a   : > { %s383_s8 = scalar_lea.sflag [#allocation5], %s382_s9 }
 0x14b   : > { %p529_p8 = pnand %p533_p3, %p1065_p5 }
 0x14d   : > { %p530_p13 = pneg %p529_p8 }
 0x14f   : > { %806 = dma.done.wait (%p530_p13), %s383_s8, 256  }
 0x150   : > { %808 = vsyncadd (%p530_p13), %s383_s8, 4294967040  ;;  %s22_s25 = sadd.s32 1, %s863_s25   ;;  %s1255_s5 = sld [smem:[#allocation18_spill]] }
 0x151   : > { %p1162_p4 = scmp.ge.s32.totalorder %s22_s25, 6   ;;  %s1256_s20 = sld [smem:[#allocation12_spill]] }
 0x152   : > { %s1257_s17 = sld [smem:[#allocation19_spill]]  ;;  %s1263_s12 = smov %s815_s13 }
 0x153   : > { %s1258_s11 = sld [smem:[#allocation13_spill]]  ;;  %s1264_s13 = smov %s819_s14 }
 0x154   : > { %s1259_s10 = sld [smem:[#allocation16_spill]]  ;;  %s1266_s15 = smov %s827_s16 }
 0x155   : > { %s1260_s3 = sld [smem:[#allocation15_spill]]  ;;  %s1268_s18 = smov %s839_s19 }
 0x156   : > { %s1261_s26 = sld [smem:[#allocation17_spill]]  ;;  %s1265_s14 = smov %s1255_s5 }
 0x157   : > { %s1267_s16 = smov %s1256_s20  ;;  %s1271_s21 = smov %s855_s23 }
 0x158   : > { %s1272_s22 = smov %s859_s24  ;;  %21 = sbr.rel (!%p1162_p4) target bundleno = 16 (0x10), region = 105 }
 0x159   : > { %s1269_s19 = smov %s1258_s11 }
 0x15a   : > { %s1270_s20 = smov %s1259_s10 }
 0x15b   : > { %s1273_s23 = smov %s1260_s3 }
 0x15c   : > { %s1274_s24 = smov %s1261_s26 }
 0x15d   :  { %389 = vsyncpa [#allocation4], 1 }
 0x15e   :  { %391 = vsyncpa [#allocation4 + $0x1], 1 }
 0x15f   :  { %392 = vsyncpa [#allocation7], 1 }
 0x160   :  { %394 = vsyncpa [#allocation7 + $0x1], 1 }
 0x161   :  { %395 = vsyncpa [#allocation5], 1 }
 0x162   :  { %397 = vsyncpa [#allocation5 + $0x1], 1 }

</bundles_post_ra>
